<compile_context>
chip_gen: v6e
topology: v6e:2x2x1
jax: 0.10.0
libtpu: 0.0.40
codegen_flags: <defaults>
</compile_context>

<pallas_src>
import jax
import jax.numpy as jnp
from jax.experimental import pallas as pl
from jax.experimental.pallas import tpu as pltpu


# ------------------------------- kernel --------------------------------------

def rnn_seq_kernel(x_ref, h0_ref, w1x_ref, w1h_ref, b1_ref, w2_ref, b2_ref,
                   out_ref, hlast_ref, h_sc):
    t = pl.program_id(1)

    # Load the initial hidden state into the resident VMEM carry (once per batch tile).
    @pl.when(t == 0)
    def _():
        h_sc[...] = h0_ref[...].astype(jnp.float32)

    cdt = w1x_ref.dtype                       # matmul compute dtype (bf16 or f32)
    x = x_ref[0]                              # (B_tile, input_size)
    h = h_sc[...].astype(cdt)                 # (B_tile, hid_pad)

    # hidden = tanh(Linear(cat(x, h)))  -- split-matmul form of the concat.
    z1 = (jnp.dot(x, w1x_ref[...], preferred_element_type=jnp.float32)
          + jnp.dot(h, w1h_ref[...], preferred_element_type=jnp.float32)
          + b1_ref[...])
    h_new = jnp.tanh(z1)                      # f32, (B_tile, hid_pad); pad cols stay 0
    h_sc[...] = h_new

    # output = log_softmax(Linear(hidden)); padded logit columns have a -1e30
    # bias so they vanish from the max / exp-sum.
    z2 = (jnp.dot(h_new.astype(cdt), w2_ref[...],
                  preferred_element_type=jnp.float32)
          + b2_ref[...])                      # (B_tile, out_pad) -- lane dense
    m = jnp.max(z2, axis=1, keepdims=True)
    s = z2 - m
    lse = jnp.log(jnp.sum(jnp.exp(s), axis=1, keepdims=True))
    out_ref[0] = (s - lse).astype(out_ref.dtype)

    # Final hidden state written back once, at the last time step.
    @pl.when(t == pl.num_programs(1) - 1)
    def _():
        hlast_ref[...] = h_sc[...].astype(hlast_ref.dtype)


# ------------------------------- wrappers -------------------------------------

def _round_up(x, m):
    return ((x + m - 1) // m) * m


def _pad_to(a, axis, target, value=0.0):
    pad = target - a.shape[axis]
    if pad <= 0:
        return a
    widths = [(0, 0)] * a.ndim
    widths[axis] = (0, pad)
    return jnp.pad(a, widths, constant_values=value)


def rnn_forward_sequence(xs, h0, w1, b1, w2, b2, *, input_size, hidden_size,
                         output_size, batch_tile=8,
                         compute_dtype=jnp.bfloat16):
    """Fused multi-step RNN forward in ONE pallas_call.

    xs : (T, B, input_size)    h0 : (B, hidden_size)
    w1 : (hidden_size, input_size + hidden_size)   b1 : (hidden_size,)
    w2 : (output_size, hidden_size)                b2 : (output_size,)
    Returns (log_softmax outputs (T, B, output_size), last hidden (B, hidden_size)).
    """
    T, B, _ = xs.shape
    b_pad = _round_up(max(B, batch_tile), batch_tile)
    hid_pad = _round_up(max(hidden_size, 128), 128)
    out_pad = _round_up(max(output_size, 128), 128)

    # Glue: pad batch / hidden / output lanes; pre-transpose, split, cast weights.
    xs_p = _pad_to(xs, 1, b_pad).astype(compute_dtype)              # (T, b_pad, in)
    h0_p = _pad_to(_pad_to(h0.astype(jnp.float32), 0, b_pad),
                   1, hid_pad)                                      # (b_pad, hid_pad)

    w1_t = w1.T                                                     # (in+hid, hid)
    w1x = _pad_to(w1_t[:input_size, :], 1, hid_pad)                 # (in,  hid_pad)
    w1x = w1x.astype(compute_dtype)
    w1h = _pad_to(_pad_to(w1_t[input_size:, :], 0, hid_pad),
                  1, hid_pad).astype(compute_dtype)                 # (hid_pad, hid_pad)
    b1_row = _pad_to(b1.reshape(1, hidden_size).astype(jnp.float32),
                     1, hid_pad)                                    # (1, hid_pad)

    w2_t = _pad_to(_pad_to(w2.T, 0, hid_pad), 1, out_pad)           # (hid_pad, out_pad)
    w2_t = w2_t.astype(compute_dtype)
    b2_row = _pad_to(b2.reshape(1, output_size).astype(jnp.float32),
                     1, out_pad, value=-1e30)                       # (1, out_pad)

    grid = (b_pad // batch_tile, T)

    outs, h_last = pl.pallas_call(
        rnn_seq_kernel,
        out_shape=(
            jax.ShapeDtypeStruct((T, b_pad, out_pad), jnp.float32),
            jax.ShapeDtypeStruct((b_pad, hid_pad), jnp.float32),
        ),
        grid=grid,
        in_specs=[
            pl.BlockSpec((1, batch_tile, input_size), lambda b, t: (t, b, 0)),
            pl.BlockSpec((batch_tile, hid_pad), lambda b, t: (b, 0)),
            pl.BlockSpec((input_size, hid_pad), lambda b, t: (0, 0)),
            pl.BlockSpec((hid_pad, hid_pad), lambda b, t: (0, 0)),
            pl.BlockSpec((1, hid_pad), lambda b, t: (0, 0)),
            pl.BlockSpec((hid_pad, out_pad), lambda b, t: (0, 0)),
            pl.BlockSpec((1, out_pad), lambda b, t: (0, 0)),
        ],
        out_specs=(
            pl.BlockSpec((1, batch_tile, out_pad), lambda b, t: (t, b, 0)),
            pl.BlockSpec((batch_tile, hid_pad), lambda b, t: (b, 0)),
        ),
        scratch_shapes=[pltpu.VMEM((batch_tile, hid_pad), jnp.float32)],
        compiler_params=pltpu.CompilerParams(
            dimension_semantics=("parallel", "arbitrary")),
    )(xs_p, h0_p, w1x, w1h, b1_row, w2_t, b2_row)

    return outs[:, :B, :output_size], h_last[:B, :hidden_size]


def rnn_forward(x, h, w1, b1, w2, b2, *, input_size, hidden_size, output_size,
                batch_tile=8, compute_dtype=jnp.bfloat16):
    """Single-step forward matching RNN.forward(input, hidden)."""
    outs, h_new = rnn_forward_sequence(
        x[None], h, w1, b1, w2, b2,
        input_size=input_size, hidden_size=hidden_size,
        output_size=output_size, batch_tile=batch_tile,
        compute_dtype=compute_dtype)
    return outs[0], h_new


# ------------------------------- reference ------------------------------------

def init_params(key, input_size, hidden_size, output_size):
    """Deterministic PyTorch-nn.Linear-style init (uniform(-1/sqrt(fan_in), ...))."""
    k1, k2, k3, k4 = jax.random.split(key, 4)
    fan1 = input_size + hidden_size
    bnd1 = 1.0 / jnp.sqrt(fan1)
    w1 = jax.random.uniform(k1, (hidden_size, fan1), jnp.float32, -bnd1, bnd1)
    b1 = jax.random.uniform(k2, (hidden_size,), jnp.float32, -bnd1, bnd1)
    fan2 = hidden_size
    bnd2 = 1.0 / jnp.sqrt(fan2)
    w2 = jax.random.uniform(k3, (output_size, fan2), jnp.float32, -bnd2, bnd2)
    b2 = jax.random.uniform(k4, (output_size,), jnp.float32, -bnd2, bnd2)
    return w1, b1, w2, b2


def rnn_reference(x, h, w1, b1, w2, b2):
    combined = jnp.concatenate([x, h], axis=1)
    h_new = jnp.tanh(combined @ w1.T + b1)
    logits = h_new @ w2.T + b2
    out = jax.nn.log_softmax(logits, axis=1)
    return out, h_new


def rnn_reference_sequence(xs, h0, w1, b1, w2, b2):
    def step(h, x):
        out, h_new = rnn_reference(x, h, w1, b1, w2, b2)
        return h_new, out
    h_last, outs = jax.lax.scan(step, h0, xs)
    return outs, h_last


# --------------------------------- main ---------------------------------------

if __name__ == "__main__":
    input_size, hidden_size, output_size = 16, 32, 10
    batch, seq_len = 2, 8

    key = jax.random.PRNGKey(0)
    kx, kh, kp, ks = jax.random.split(key, 4)
    x = jax.random.normal(kx, (batch, input_size), jnp.float32)
    h = jax.random.normal(kh, (batch, hidden_size), jnp.float32)
    w1, b1, w2, b2 = init_params(kp, input_size, hidden_size, output_size)

    kw = dict(input_size=input_size, hidden_size=hidden_size,
              output_size=output_size)

    # 1) single-step (exact module forward), f32 matmuls -> tight check.
    out32, hn32 = rnn_forward(x, h, w1, b1, w2, b2,
                              compute_dtype=jnp.float32, **kw)
    jax.block_until_ready((out32, hn32))
    out_ref, h_ref = rnn_reference(x, h, w1, b1, w2, b2)
    assert jnp.allclose(out32, out_ref, atol=1e-4, rtol=1e-4)
    assert jnp.allclose(hn32, h_ref, atol=1e-4, rtol=1e-4)

    # 2) single-step with bf16 matmul operands (default fast path).
    out_bf, hn_bf = rnn_forward(x, h, w1, b1, w2, b2, **kw)
    jax.block_until_ready((out_bf, hn_bf))
    assert jnp.allclose(out_bf, out_ref, atol=5e-2, rtol=5e-2)
    assert jnp.allclose(hn_bf, h_ref, atol=5e-2, rtol=5e-2)

    # 3) fused sequence: T steps in ONE pallas_call, hidden carried in VMEM scratch.
    xs = jax.random.normal(ks, (seq_len, batch, input_size), jnp.float32)
    h0 = jnp.zeros((batch, hidden_size), jnp.float32)   # RNN.initHidden()
    outs, h_last = rnn_forward_sequence(xs, h0, w1, b1, w2, b2, **kw)
    jax.block_until_ready((outs, h_last))
    outs_ref, h_last_ref = rnn_reference_sequence(xs, h0, w1, b1, w2, b2)
    assert jnp.allclose(outs, outs_ref, atol=5e-2, rtol=5e-2)
    assert jnp.allclose(h_last, h_last_ref, atol=5e-2, rtol=5e-2)

    print("KERNEL_OK")
</pallas_src>

<mosaic_0001>
module attributes {stable_mosaic.version = 11 : i64} {
  func.func @rnn_seq_kernel(%arg0: i32, %arg1: i32, %arg2: memref<1x8x16xf32, #tpu.memory_space<vmem>>, %arg3: memref<8x128xf32, #tpu.memory_space<vmem>>, %arg4: memref<16x128xf32, #tpu.memory_space<vmem>>, %arg5: memref<128x128xf32, #tpu.memory_space<vmem>>, %arg6: memref<1x128xf32, #tpu.memory_space<vmem>>, %arg7: memref<128x128xf32, #tpu.memory_space<vmem>>, %arg8: memref<1x128xf32, #tpu.memory_space<vmem>>, %arg9: memref<1x8x128xf32, #tpu.memory_space<vmem>>, %arg10: memref<8x128xf32, #tpu.memory_space<vmem>>, %arg11: memref<8x128xf32, #tpu.memory_space<vmem>>) attributes {dimension_semantics = [#tpu.dimension_semantics<parallel>, #tpu.dimension_semantics<arbitrary>], iteration_bounds = array<i64: 1, 1>, scalar_prefetch = 0 : i64, scratch_operands = 1 : i64, tpu.core_type = #tpu.core_type<tc>, window_params = [{transform_indices = @transform_0, window_bounds = array<i64: 1, 8, 16>}, {transform_indices = @transform_1, window_bounds = array<i64: 8, 128>}, {pipeline_mode = #tpu.pipeline_mode<synchronous>, transform_indices = @transform_2, window_bounds = array<i64: 16, 128>}, {pipeline_mode = #tpu.pipeline_mode<synchronous>, transform_indices = @transform_3, window_bounds = array<i64: 128, 128>}, {pipeline_mode = #tpu.pipeline_mode<synchronous>, transform_indices = @transform_4, window_bounds = array<i64: 1, 128>}, {pipeline_mode = #tpu.pipeline_mode<synchronous>, transform_indices = @transform_5, window_bounds = array<i64: 128, 128>}, {pipeline_mode = #tpu.pipeline_mode<synchronous>, transform_indices = @transform_6, window_bounds = array<i64: 1, 128>}, {transform_indices = @transform_7, window_bounds = array<i64: 1, 8, 128>}, {transform_indices = @transform_8, window_bounds = array<i64: 8, 128>}]} {
    %c0_i32 = arith.constant 0 : i32
    %0 = arith.cmpi eq, %arg1, %c0_i32 : i32
    %1 = arith.extui %0 : i1 to i32
    %c0_i32_0 = arith.constant 0 : i32
    %2 = arith.cmpi ne, %1, %c0_i32_0 : i32
    scf.if %2 {
      %c0_26 = arith.constant 0 : index
      %c0_27 = arith.constant 0 : index
      %37 = vector.load %arg3[%c0_26, %c0_27] : memref<8x128xf32, #tpu.memory_space<vmem>>, vector<8x128xf32>
      %c0_28 = arith.constant 0 : index
      %c0_29 = arith.constant 0 : index
      %38 = vector.load %arg11[%c0_28, %c0_29] : memref<8x128xf32, #tpu.memory_space<vmem>>, vector<8x128xf32>
      tpu.vector_store %arg11[%c0_28, %c0_29], %37 {strides = array<i32>} : memref<8x128xf32, #tpu.memory_space<vmem>>, vector<8x128xf32>,
    } else {
    }
    %c0 = arith.constant 0 : index
    %c0_1 = arith.constant 0 : index
    %c0_2 = arith.constant 0 : index
    %3 = vector.load %arg2[%c0, %c0_1, %c0_2] : memref<1x8x16xf32, #tpu.memory_space<vmem>>, vector<1x8x16xf32>
    %4 = vector.shape_cast %3 : vector<1x8x16xf32> to vector<8x16xf32>
    %c0_3 = arith.constant 0 : index
    %c0_4 = arith.constant 0 : index
    %5 = vector.load %arg11[%c0_3, %c0_4] : memref<8x128xf32, #tpu.memory_space<vmem>>, vector<8x128xf32>
    %c0_5 = arith.constant 0 : index
    %c0_6 = arith.constant 0 : index
    %6 = vector.load %arg4[%c0_5, %c0_6] : memref<16x128xf32, #tpu.memory_space<vmem>>, vector<16x128xf32>
    %cst = arith.constant dense<0.000000e+00> : vector<8x128xf32>
    %7 = tpu.matmul %4, %6, %cst {dimension_numbers = #tpu.dot_dimension_numbers<[1], [0], [0], [1], [0, 0, 1, 1], [], []>} : vector<8x16xf32>, vector<16x128xf32>, vector<8x128xf32> -> vector<8x128xf32>
    %c0_7 = arith.constant 0 : index
    %c0_8 = arith.constant 0 : index
    %8 = vector.load %arg5[%c0_7, %c0_8] : memref<128x128xf32, #tpu.memory_space<vmem>>, vector<128x128xf32>
    %cst_9 = arith.constant dense<0.000000e+00> : vector<8x128xf32>
    %9 = tpu.matmul %5, %8, %cst_9 {dimension_numbers = #tpu.dot_dimension_numbers<[1], [0], [0], [1], [0, 0, 1, 1], [], []>} : vector<8x128xf32>, vector<128x128xf32>, vector<8x128xf32> -> vector<8x128xf32>
    %10 = arith.addf %7, %9 : vector<8x128xf32>
    %c0_10 = arith.constant 0 : index
    %c0_11 = arith.constant 0 : index
    %11 = vector.load %arg6[%c0_10, %c0_11] : memref<1x128xf32, #tpu.memory_space<vmem>>, vector<1x128xf32>
    %12 = vector.broadcast %11 : vector<1x128xf32> to vector<8x128xf32>
    %13 = arith.addf %10, %12 : vector<8x128xf32>
    %14 = math.tanh %13 : vector<8x128xf32>
    %c0_12 = arith.constant 0 : index
    %c0_13 = arith.constant 0 : index
    %15 = vector.load %arg11[%c0_12, %c0_13] : memref<8x128xf32, #tpu.memory_space<vmem>>, vector<8x128xf32>
    tpu.vector_store %arg11[%c0_12, %c0_13], %14 {strides = array<i32>} : memref<8x128xf32, #tpu.memory_space<vmem>>, vector<8x128xf32>,
    %c0_14 = arith.constant 0 : index
    %c0_15 = arith.constant 0 : index
    %16 = vector.load %arg7[%c0_14, %c0_15] : memref<128x128xf32, #tpu.memory_space<vmem>>, vector<128x128xf32>
    %cst_16 = arith.constant dense<0.000000e+00> : vector<8x128xf32>
    %17 = tpu.matmul %14, %16, %cst_16 {dimension_numbers = #tpu.dot_dimension_numbers<[1], [0], [0], [1], [0, 0, 1, 1], [], []>} : vector<8x128xf32>, vector<128x128xf32>, vector<8x128xf32> -> vector<8x128xf32>
    %c0_17 = arith.constant 0 : index
    %c0_18 = arith.constant 0 : index
    %18 = vector.load %arg8[%c0_17, %c0_18] : memref<1x128xf32, #tpu.memory_space<vmem>>, vector<1x128xf32>
    %19 = vector.broadcast %18 : vector<1x128xf32> to vector<8x128xf32>
    %20 = arith.addf %17, %19 : vector<8x128xf32>
    %cst_19 = arith.constant dense<0xFF800000> : vector<8xf32>
    %21 = vector.multi_reduction <maximumf>, %20, %cst_19 [1] : vector<8x128xf32> to vector<8xf32>
    %22 = vector.shape_cast %21 : vector<8xf32> to vector<8x1xf32>
    %23 = vector.broadcast %22 : vector<8x1xf32> to vector<8x128xf32>
    %24 = arith.subf %20, %23 : vector<8x128xf32>
    %25 = math.exp %24 : vector<8x128xf32>
    %cst_20 = arith.constant dense<0.000000e+00> : vector<8xf32>
    %26 = vector.multi_reduction <add>, %25, %cst_20 [1] : vector<8x128xf32> to vector<8xf32>
    %27 = vector.shape_cast %26 : vector<8xf32> to vector<8x1xf32>
    %28 = math.log %27 : vector<8x1xf32>
    %29 = vector.broadcast %28 : vector<8x1xf32> to vector<8x128xf32>
    %30 = arith.subf %24, %29 : vector<8x128xf32>
    %c0_21 = arith.constant 0 : index
    %c0_22 = arith.constant 0 : index
    %c0_23 = arith.constant 0 : index
    %31 = vector.load %arg9[%c0_21, %c0_22, %c0_23] : memref<1x8x128xf32, #tpu.memory_space<vmem>>, vector<1x8x128xf32>
    %32 = vector.shape_cast %31 : vector<1x8x128xf32> to vector<8x128xf32>
    %33 = vector.shape_cast %30 : vector<8x128xf32> to vector<1x8x128xf32>
    tpu.vector_store %arg9[%c0_21, %c0_22, %c0_23], %33 {strides = array<i32>} : memref<1x8x128xf32, #tpu.memory_space<vmem>>, vector<1x8x128xf32>,
    %c0_i32_24 = arith.constant 0 : i32
    %34 = arith.cmpi eq, %arg1, %c0_i32_24 : i32
    %35 = arith.extui %34 : i1 to i32
    %c0_i32_25 = arith.constant 0 : i32
    %36 = arith.cmpi ne, %35, %c0_i32_25 : i32
    scf.if %36 {
      %c0_26 = arith.constant 0 : index
      %c0_27 = arith.constant 0 : index
      %37 = vector.load %arg11[%c0_26, %c0_27] : memref<8x128xf32, #tpu.memory_space<vmem>>, vector<8x128xf32>
      %c0_28 = arith.constant 0 : index
      %c0_29 = arith.constant 0 : index
      %38 = vector.load %arg10[%c0_28, %c0_29] : memref<8x128xf32, #tpu.memory_space<vmem>>, vector<8x128xf32>
      tpu.vector_store %arg10[%c0_28, %c0_29], %37 {strides = array<i32>} : memref<8x128xf32, #tpu.memory_space<vmem>>, vector<8x128xf32>,
    } else {
    }
    return
  }
  func.func @transform_0(%arg0: i32, %arg1: i32) -> (i32, i32, i32) {
    %c0_i32 = arith.constant 0 : i32
    %c0_i32_0 = arith.constant 0 : i32
    return %arg1, %arg0, %c0_i32 : i32, i32, i32
  }
  func.func @transform_1(%arg0: i32, %arg1: i32) -> (i32, i32) {
    %c0_i32 = arith.constant 0 : i32
    %c0_i32_0 = arith.constant 0 : i32
    return %arg0, %c0_i32 : i32, i32
  }
  func.func @transform_2(%arg0: i32, %arg1: i32) -> (i32, i32) {
    %c0_i32 = arith.constant 0 : i32
    %c0_i32_0 = arith.constant 0 : i32
    %c0_i32_1 = arith.constant 0 : i32
    return %c0_i32, %c0_i32_0 : i32, i32
  }
  func.func @transform_3(%arg0: i32, %arg1: i32) -> (i32, i32) {
    %c0_i32 = arith.constant 0 : i32
    %c0_i32_0 = arith.constant 0 : i32
    %c0_i32_1 = arith.constant 0 : i32
    return %c0_i32, %c0_i32_0 : i32, i32
  }
  func.func @transform_4(%arg0: i32, %arg1: i32) -> (i32, i32) {
    %c0_i32 = arith.constant 0 : i32
    %c0_i32_0 = arith.constant 0 : i32
    %c0_i32_1 = arith.constant 0 : i32
    return %c0_i32, %c0_i32_0 : i32, i32
  }
  func.func @transform_5(%arg0: i32, %arg1: i32) -> (i32, i32) {
    %c0_i32 = arith.constant 0 : i32
    %c0_i32_0 = arith.constant 0 : i32
    %c0_i32_1 = arith.constant 0 : i32
    return %c0_i32, %c0_i32_0 : i32, i32
  }
  func.func @transform_6(%arg0: i32, %arg1: i32) -> (i32, i32) {
    %c0_i32 = arith.constant 0 : i32
    %c0_i32_0 = arith.constant 0 : i32
    %c0_i32_1 = arith.constant 0 : i32
    return %c0_i32, %c0_i32_0 : i32, i32
  }
  func.func @transform_7(%arg0: i32, %arg1: i32) -> (i32, i32, i32) {
    %c0_i32 = arith.constant 0 : i32
    %c0_i32_0 = arith.constant 0 : i32
    return %arg1, %arg0, %c0_i32 : i32, i32, i32
  }
  func.func @transform_8(%arg0: i32, %arg1: i32) -> (i32, i32) {
    %c0_i32 = arith.constant 0 : i32
    %c0_i32_0 = arith.constant 0 : i32
    return %arg0, %c0_i32 : i32, i32
  }
}

</mosaic_0001>

<bundles_post_ra>
// kernel: tpu_custom_call.1
= control target key start
LH: loop header
LB: loop body
LE: loop exit
PB: predicated region body
PF: predicated region fallthrough
CT: control target
= control target key end

     0   :  { %14 = vsyncpa [#allocation4], 0  ;;  %s830_s0 = inlined_call_operand.hbm [shape: f32[1,8,16], index: 0, kind: input, shape index: {}]   ;;  %s831_s1 = inlined_call_operand.hbm [shape: f32[8,128], index: 1, kind: input, shape index: {}]   ;;  %s832_s2 = inlined_call_operand.hbm [shape: f32[16,128], index: 2, kind: input, shape index: {}]   ;;  %s833_s3 = inlined_call_operand.hbm [shape: f32[128,128], index: 3, kind: input, shape index: {}]   ;;  %s834_s4 = inlined_call_operand.vmem [shape: f32[1,128], index: 4, kind: input, shape index: {}]   ;;  %s835_s5 = inlined_call_operand.hbm [shape: f32[128,128], index: 5, kind: input, shape index: {}]   ;;  %s836_s6 = inlined_call_operand.vmem [shape: f32[1,128], index: 6, kind: input, shape index: {}]   ;;  %s837_s7 = inlined_call_operand.hbm [shape: f32[1,8,128], index: 7, kind: output, shape index: {0}]   ;;  %s838_s8 = inlined_call_operand.hbm [shape: f32[8,128], index: 8, kind: output, shape index: {1}]  }
   0x1   :  { %15 = vsyncpa [#allocation7], 0 }
   0x2   :  { %16 = vsyncpa [#allocation10], 0 }
   0x3   :  { %17 = vsyncpa [#allocation5], 0 }
   0x4   :  { %18 = vsyncpa [#allocation14], 0  ;;  %s698_s27 = smov [#allocation6]  }
   0x5   :  { %s35_s28 = sshll.u32 %s698_s27, 4  ;;  %s36_s28 = int_to_ptr.vmem [resolvable:$true] %s35_s28 }
   0x6   :  { %s556_s29 = scalar_lea.vmem %s36_s28, 128  ;;  %p561_p1 = scmp.lt.s32.totalorder %s36_s28, %s36_s28 }
   0x7   :  { %p557_p0 = scmp.ne.s32.totalorder %s36_s28, %s556_s29  ;;  %p562_p2 = scmp.lt.s32.totalorder %s556_s29, %s556_s29 }
   0x9   :  { %p563_p3 = por %p562_p2, %p561_p1 }
   0xb   :  { %p564_p4 = pnand %p563_p3, %p557_p0 }
   0xd   :  { %567 = shalt.err (!%p564_p4)
}
   0xe   :  { %38 = dma.hbm_to_vmem [thread:$0]  %s831_s1, 128, %s36_s28, [#allocation7]  }
   0xf   :  { %s699_s10 = smov [#allocation9]   ;;  %s700_s12 = smov [#allocation3]  }
  0x10   :  { %s56_s11 = sshll.u32 %s699_s10, 4  ;;  %s25_s13 = sshll.u32 %s700_s12, 4  ;;  %s57_s11 = int_to_ptr.vmem [resolvable:$true] %s56_s11  ;;  %s26_s13 = int_to_ptr.vmem [resolvable:$true] %s25_s13 }
  0x11   :  { %s576_s14 = scalar_lea.vmem %s57_s11, 2048  ;;  %p581_p6 = scmp.lt.s32.totalorder %s57_s11, %s57_s11 }
  0x12   :  { %p577_p5 = scmp.ne.s32.totalorder %s57_s11, %s576_s14  ;;  %p582_p7 = scmp.lt.s32.totalorder %s576_s14, %s576_s14 }
  0x14   :  { %p583_p8 = por %p582_p7, %p581_p6 }
  0x16   :  { %p584_p9 = pnand %p583_p8, %p577_p5 }
  0x18   :  { %587 = shalt.err (!%p584_p9)
}
  0x19   :  { %s701_s15 = smov 128   ;;  %s702_s16 = smov 8  }
  0x1a   :  { %62 = dma.hbm_to_vmem [thread:$0]  %s833_s3, 2048, %s57_s11, [#allocation10], %s701_s15, %s701_s15, %s702_s16  }
  0x1b   :  { %s596_s1 = scalar_lea.vmem %s26_s13, 128  ;;  %p601_p11 = scmp.lt.s32.totalorder %s26_s13, %s26_s13 }
  0x1c   :  { %p597_p10 = scmp.ne.s32.totalorder %s26_s13, %s596_s1  ;;  %p602_p12 = scmp.lt.s32.totalorder %s596_s1, %s596_s1 }
  0x1e   :  { %p603_p13 = por %p602_p12, %p601_p11 }
  0x20   :  { %p604_p0 = pnand %p603_p13, %p597_p10 }
  0x22   :  { %607 = shalt.err (!%p604_p0)
}
  0x23   :  { %28 = dma.hbm_to_vmem [thread:$0]  %s830_s0, 128, %s26_s13, [#allocation4]  }
  0x24   :  { %s703_s21 = smov [#allocation8]   ;;  %s704_s23 = smov [#allocation11]  }
  0x25   :  { %s44_s22 = sshll.u32 %s703_s21, 4  ;;  %s70_s24 = sshll.u32 %s704_s23, 4  ;;  %s45_s22 = int_to_ptr.vmem [resolvable:$true] %s44_s22  ;;  %s71_s24 = int_to_ptr.vmem [resolvable:$true] %s70_s24 }
  0x26   :  { %s616_s25 = scalar_lea.vmem %s45_s22, 256  ;;  %p621_p2 = scmp.lt.s32.totalorder %s45_s22, %s45_s22 }
  0x27   :  { %p617_p1 = scmp.ne.s32.totalorder %s45_s22, %s616_s25  ;;  %p622_p3 = scmp.lt.s32.totalorder %s616_s25, %s616_s25 }
  0x29   :  { %p623_p4 = por %p622_p3, %p621_p2 }
  0x2b   :  { %p624_p5 = pnand %p623_p4, %p617_p1 }
  0x2d   :  { %627 = shalt.err (!%p624_p5)
}
  0x2e   :  { %50 = dma.hbm_to_vmem [thread:$0]  %s832_s2, 256, %s45_s22, [#allocation7], %s701_s15, %s701_s15, %s702_s16  }
  0x2f   :  { %s636_s0 = scalar_lea.vmem %s71_s24, 2048  ;;  %p641_p7 = scmp.lt.s32.totalorder %s71_s24, %s71_s24 }
  0x30   :  { %p637_p6 = scmp.ne.s32.totalorder %s71_s24, %s636_s0  ;;  %p642_p8 = scmp.lt.s32.totalorder %s636_s0, %s636_s0 }
  0x32   :  { %p643_p9 = por %p642_p8, %p641_p7 }
  0x34   :  { %p644_p10 = pnand %p643_p9, %p637_p6 }
  0x36   :  { %647 = shalt.err (!%p644_p10)
}
  0x37   :  { %76 = dma.hbm_to_vmem [thread:$0]  %s835_s5, 2048, %s71_s24, [#allocation10], %s701_s15, %s701_s15, %s702_s16  }
  0x38   :  { %688 = dma.done.wait [#allocation4], 128  }
  0x39   :  { %689 = vsyncadd [#allocation4], 4294967168 }
  0x3a   :  { %690 = dma.done.wait [#allocation7], 384  }
  0x3b   :  { %691 = vsyncadd [#allocation7], 4294966912 }
  0x3c   :  { %692 = dma.done.wait [#allocation10], 4096  }
  0x3d   :  { %693 = vsyncadd [#allocation10], 4294963200  ;;  %v705_v0 = vmov 0.0   ;;  %vm706_vm0 = vmmov 0   ;;  %v119_v1 = vld [vmem:[#allocation9 + $0x78] sm:$0xff]  ;;  %v118_v2 = vld [vmem:[#allocation9 + $0x70] sm:$0xff] }
  0x3e   :  { %454 = vmatprep.subr.mxu0 %v705_v0  ;;  %489 = vmatprep.subr.mxu1 %v705_v0  ;;  %v117_v3 = vld [vmem:[#allocation9 + $0x68] sm:$0xff]  ;;  %v116_v4 = vld [vmem:[#allocation9 + $0x60] sm:$0xff]  ;;  %v103_v5 = vld [vmem:[#allocation8 + $0x8] sm:$0xff]  ;;  %vm190_vm1 = vcmask 130048  }
  0x3f   :  { %493 = vmatprep.mubr.msk.f32.mxu1 %vm706_vm0, %v705_v0  ;;  %486 = vmatprep.mubr.msk.f32.mxu0 %vm706_vm0, %v705_v0  ;;  %v102_v6 = vld [vmem:[#allocation8] sm:$0xff]  ;;  %v100_v7 = vld [vmem:[#allocation3] sm:$0xff]  ;;  %v115_v8 = vld [vmem:[#allocation9 + $0x58] sm:$0xff] }
  0x40   :  { %455 = vmatpush3.msra.mxu0 %v119_v1  ;;  %490 = vmatpush3.msra.mxu1 %v103_v5  ;;  %v289_v9 = vld [vmem:[#allocation11 + $0x78] sm:$0xff]  ;;  %v114_v10 = vld [vmem:[#allocation9 + $0x50] sm:$0xff]  ;;  %v113_v12 = vld [vmem:[#allocation9 + $0x48] sm:$0xff] }
  0x41   :  { %456 = vmatprep.subr.mxu0 %v705_v0  ;;  %491 = vmatprep.subr.mxu1 %v705_v0  ;;  %v288_v11 = vld [vmem:[#allocation11 + $0x70] sm:$0xff]  ;;  %v287_v13 = vld [vmem:[#allocation11 + $0x68] sm:$0xff]  ;;  %v112_v14 = vld [vmem:[#allocation9 + $0x40] sm:$0xff] }
  0x42   :  { %457 = vmatpush3.msra.mxu0 %v118_v2  ;;  %492 = vmatpush3.msra.mxu1 %v102_v6  ;;  %v286_v15 = vld [vmem:[#allocation11 + $0x60] sm:$0xff]  ;;  %v111_v16 = vld [vmem:[#allocation9 + $0x38] sm:$0xff]  ;;  %v110_v18 = vld [vmem:[#allocation9 + $0x30] sm:$0xff] }
  0x43   :  { %458 = vmatprep.subr.mxu0 %v705_v0  ;;  %494 = vmatmul.mubr.msk.f32.vlgmr.msra.gmra.mxu1 %vm190_vm1, %v100_v7  ;;  %v285_v17 = vld [vmem:[#allocation11 + $0x58] sm:$0xff]  ;;  %v109_v19 = vld [vmem:[#allocation9 + $0x28] sm:$0xff]  ;;  %v108_v20 = vld [vmem:[#allocation9 + $0x20] sm:$0xff] }
  0x44   :  { %459 = vmatpush3.msra.mxu0 %v117_v3  ;;  %496 = vmatprep.subr.mxu1 %v705_v0  ;;  %v107_v21 = vld [vmem:[#allocation9 + $0x18] sm:$0xff]  ;;  %v106_v22 = vld [vmem:[#allocation9 + $0x10] sm:$0xff]  ;;  %v105_v23 = vld [vmem:[#allocation9 + $0x8] sm:$0xff] }
  0x45   :  { %460 = vmatprep.subr.mxu0 %v705_v0  ;;  %497 = vmatpush3.msra.mxu1 %v289_v9  ;;  %v104_v24 = vld [vmem:[#allocation9] sm:$0xff]  ;;  %v98_v25 = vld [vmem:[#allocation6] sm:$0xff]  ;;  %v284_v26 = vld [vmem:[#allocation11 + $0x50] sm:$0xff] }
  0x46   :  { %461 = vmatpush3.msra.mxu0 %v116_v4  ;;  %498 = vmatprep.subr.mxu1 %v705_v0  ;;  %v283_v27 = vld [vmem:[#allocation11 + $0x48] sm:$0xff]  ;;  %v282_v28 = vld [vmem:[#allocation11 + $0x40] sm:$0xff]  ;;  %v281_v29 = vld [vmem:[#allocation11 + $0x38] sm:$0xff] }
  0x47   :  { %462 = vmatprep.subr.mxu0 %v705_v0  ;;  %499 = vmatpush3.msra.mxu1 %v288_v11  ;;  %v280_v30 = vld [vmem:[#allocation11 + $0x30] sm:$0xff]  ;;  %v279_v31 = vld [vmem:[#allocation11 + $0x28] sm:$0xff]  ;;  %v278_v32 = vld [vmem:[#allocation11 + $0x20] sm:$0xff] }
  0x48   :  { %463 = vmatpush3.msra.mxu0 %v115_v8  ;;  %500 = vmatprep.subr.mxu1 %v705_v0  ;;  %v277_v33 = vld [vmem:[#allocation11 + $0x18] sm:$0xff]  ;;  %v276_v34 = vld [vmem:[#allocation11 + $0x10] sm:$0xff]  ;;  %v275_v35 = vld [vmem:[#allocation11 + $0x8] sm:$0xff] }
  0x49   :  { %464 = vmatprep.subr.mxu0 %v705_v0  ;;  %501 = vmatpush3.msra.mxu1 %v287_v13  ;;  %v274_v36 = vld [vmem:[#allocation11] sm:$0xff] }
  0x4a   :  { %465 = vmatpush3.msra.mxu0 %v114_v10  ;;  %502 = vmatprep.subr.mxu1 %v705_v0  ;;  %v415_v40 = vld [vmem:[%s834_s4] ss:$0 sm:$0xff]  ;;  %s707_s4 = smov [#allocation13]  }
  0x4b   :  { %466 = vmatprep.subr.mxu0 %v705_v0  ;;  %503 = vmatpush3.msra.mxu1 %v286_v15  ;;  %v416_v45 = vld [vmem:[%s836_s6] ss:$0 sm:$0xff]  ;;  %s399_s9 = sshll.u32 %s707_s4, 4  ;;  %s400_s9 = int_to_ptr.vmem [resolvable:$true] %s399_s9 }
  0x4c   :  { %467 = vmatpush3.msra.mxu0 %v113_v12  ;;  %504 = vmatprep.subr.mxu1 %v705_v0  ;;  %s648_s10 = scalar_lea.vmem %s400_s9, 128  ;;  %p653_p12 = scmp.lt.s32.totalorder %s400_s9, %s400_s9 }
  0x4d   :  { %468 = vmatprep.subr.mxu0 %v705_v0  ;;  %505 = vmatpush3.msra.mxu1 %v285_v17  ;;  %p649_p11 = scmp.ne.s32.totalorder %s400_s9, %s648_s10  ;;  %p654_p13 = scmp.lt.s32.totalorder %s648_s10, %s648_s10 }
  0x4e   :  { %469 = vmatpush3.msra.mxu0 %v112_v14  ;;  %506 = vmatprep.subr.mxu1 %v705_v0 }
  0x4f   :  { %470 = vmatprep.subr.mxu0 %v705_v0  ;;  %528 = vmatprep.mubr.msk.f32.mxu1 %vm706_vm0, %v705_v0  ;;  %p655_p0 = por %p654_p13, %p653_p12 }
  0x50   :  { %471 = vmatpush3.msra.mxu0 %v111_v16  ;;  %507 = vmatpush3.msra.mxu1 %v284_v26 }
  0x51   :  { %472 = vmatprep.subr.mxu0 %v705_v0  ;;  %508 = vmatprep.subr.mxu1 %v705_v0  ;;  %p656_p1 = pnand %p655_p0, %p649_p11 }
  0x52   :  { %473 = vmatpush3.msra.mxu0 %v110_v18  ;;  %509 = vmatpush3.msra.mxu1 %v283_v27 }
  0x53   :  { %474 = vmatprep.subr.mxu0 %v705_v0  ;;  %510 = vmatprep.subr.mxu1 %v705_v0 }
  0x54   :  { %475 = vmatpush3.msra.mxu0 %v109_v19  ;;  %511 = vmatpush3.msra.mxu1 %v282_v28 }
  0x55   :  { %476 = vmatprep.subr.mxu0 %v705_v0  ;;  %512 = vmatprep.subr.mxu1 %v705_v0 }
  0x56   :  { %477 = vmatpush3.msra.mxu0 %v108_v20  ;;  %513 = vmatpush3.msra.mxu1 %v281_v29 }
  0x57   :  { %478 = vmatprep.subr.mxu0 %v705_v0  ;;  %514 = vmatprep.subr.mxu1 %v705_v0 }
  0x58   :  { %479 = vmatpush3.msra.mxu0 %v107_v21  ;;  %515 = vmatpush3.msra.mxu1 %v280_v30 }
  0x59   :  { %480 = vmatprep.subr.mxu0 %v705_v0  ;;  %516 = vmatprep.subr.mxu1 %v705_v0 }
  0x5a   :  { %481 = vmatpush3.msra.mxu0 %v106_v22  ;;  %517 = vmatpush3.msra.mxu1 %v279_v31 }
  0x5b   :  { %482 = vmatprep.subr.mxu0 %v705_v0  ;;  %518 = vmatprep.subr.mxu1 %v705_v0 }
  0x5c   :  { %483 = vmatpush3.msra.mxu0 %v105_v23  ;;  %519 = vmatpush3.msra.mxu1 %v278_v32 }
  0x5d   :  { %484 = vmatprep.subr.mxu0 %v705_v0  ;;  %520 = vmatprep.subr.mxu1 %v705_v0 }
  0x5e   :  { %485 = vmatpush3.msra.mxu0 %v104_v24  ;;  %521 = vmatpush3.msra.mxu1 %v277_v33 }
  0x5f   :  { %487 = vmatmul.mubr.f32.vlgmr.msra.gmra.mxu0 %v98_v25  ;;  %522 = vmatprep.subr.mxu1 %v705_v0 }
  0x60   :  { %523 = vmatpush3.msra.mxu1 %v276_v34 }
  0x61   :  { %524 = vmatprep.subr.mxu1 %v705_v0 }
  0x62   :  { %525 = vmatpush3.msra.mxu1 %v275_v35 }
  0x63   :  { %526 = vmatprep.subr.mxu1 %v705_v0 }
  0x64   :  { %527 = vmatpush3.msra.mxu1 %v274_v36 }
 0x103   :  { %v260_v37 = vpop.f32.mrf.mxu1 }
 0x105   :  { %v495_v38 = vpop.f32.mrf.mxu1 }
 0x11f   :  { %v186_v39 = vpop.f32.mrf.mxu0 }
 0x120   :  { %v261_v41 = vadd.f32 %v260_v37, %v186_v39 }
 0x121   :  { %v488_v42 = vpop.f32.mrf.mxu0 }
 0x122   :  { %v271_v43 = vadd.f32 %v415_v40, %v261_v41 }
 0x124   :  { %542 = vtanh.f32 %v271_v43 }
 0x131   :  { %v543_v44 = vpop.eup %542 }
 0x132   :  { %382 = vst [vmem:[#allocation13] sm:$0xff] %v543_v44  ;;  %529 = vmatmul.mubr.f32.vlgmr.msra.gmra.mxu1 %v543_v44 }
 0x1f2   :  { %v363_v46 = vpop.f32.mrf.mxu1 }
 0x1f3   :  { %v364_v47 = vadd.f32 %v416_v45, %v363_v46 }
 0x1f4   :  { %v530_v48 = vpop.f32.mrf.mxu1 }
 0x1f5   :  { %367 = vmax.xlane.f32.xlu0 %v364_v47 }
 0x27e   :  { %v368_v49 = vpop.xlane.xlu0 %367 }
 0x27f   :  { %v369_v50 = vsub.f32 %v364_v47, %v368_v49 }
 0x281   :  { %v370_v51 = vmul.f32 1.442695, %v369_v50 }
 0x283   :  { %544 = vpow2.f32 %v370_v51 }
 0x290   :  { %v545_v52 = vpop.eup %544 }
 0x291   :  { %372 = vadd.xlane.f32.xlu0 %v545_v52 }
 0x292   :  { %659 = shalt.err (!%p656_p1)
}
 0x293   :  { %402 = dma.vmem_to_hbm [thread:$0]  %s400_s9, 128, %s838_s8, [#allocation14]  }
 0x294   :  { %s708_s12 = smov [#allocation12]  }
 0x295   :  { %s389_s13 = sshll.u32 %s708_s12, 4  ;;  %s390_s13 = int_to_ptr.vmem [resolvable:$true] %s389_s13 }
 0x296   :  { %s668_s14 = scalar_lea.vmem %s390_s13, 128  ;;  %p673_p3 = scmp.lt.s32.totalorder %s390_s13, %s390_s13 }
 0x297   :  { %p669_p2 = scmp.ne.s32.totalorder %s390_s13, %s668_s14  ;;  %p674_p4 = scmp.lt.s32.totalorder %s668_s14, %s668_s14 }
 0x299   :  { %p675_p5 = por %p674_p4, %p673_p3 }
 0x29b   :  { %p676_p6 = pnand %p675_p5, %p669_p2 }
 0x31a   :  { %v373_v53 = vpop.xlane.xlu0 %372 }
 0x31b   :  { %546 = vlog2.f32 %v373_v53 }
 0x328   :  { %v547_v54 = vpop.eup %546 }
 0x329   :  { %v375_v55 = vmul.f32 0.6931472, %v547_v54 }
 0x32b   :  { %v376_v56 = vsub.f32 %v369_v50, %v375_v55 }
 0x32d   :  { %377 = vst [vmem:[#allocation12] sm:$0xff] %v376_v56 }
 0x32e   :  { %679 = shalt.err (!%p676_p6)
}
 0x32f   :  { %392 = dma.vmem_to_hbm [thread:$0]  %s390_s13, 128, %s837_s7, [#allocation5]  }
 0x330   :  { %694 = dma.done.wait [#allocation5], 128  }
 0x331   :  { %695 = vsyncadd [#allocation5], 4294967168 }
 0x332   :  { %696 = dma.done.wait [#allocation14], 128  }
 0x333   :  { %697 = vsyncadd [#allocation14], 4294967168 }
 0x334   :  { %409 = vsyncpa [#allocation4], 1 }
 0x335   :  { %410 = vsyncpa [#allocation7], 1 }
 0x336   :  { %411 = vsyncpa [#allocation10], 1 }
 0x337   :  { %412 = vsyncpa [#allocation5], 1 }
 0x338   :  { %413 = vsyncpa [#allocation14], 1 }

</bundles_post_ra>
